<compile_context>
chip_gen: v5e
topology: v5e:2x2
jax: 0.10.0
libtpu: 0.0.40
codegen_flags: <defaults>
</compile_context>

<pallas_src>
import functools

import jax
import jax.numpy as jnp
from jax.experimental import pallas as pl
from jax.experimental.pallas import tpu as pltpu

_VMEM_LIMIT = 32 * 1024 * 1024   # safe on v5e/v6e (128 MiB phys) and v7x (64 MiB phys)
_EPS = 1e-5
_TM_CAP = 1024                   # row-tile cap (multiple of 8); ~1.5 MiB/buffer at C=128


def _round_up(x, m):
    return (x + m - 1) // m * m


def _pick_tm(m):
    """Row tile: full dim if it fits (block == full dim is always legal),
    otherwise an 8-aligned cap with a cdiv grid (partial last block)."""
    return m if m <= _TM_CAP else _TM_CAP


def _pad_last(a, to):
    pad = to - a.shape[-1]
    if pad == 0:
        return a
    return jnp.pad(a, [(0, 0)] * (a.ndim - 1) + [(0, pad)])


# ------------------------------------------------------------------ kernels --

def _mm_bias_tanh_kernel(x_ref, w_ref, b_ref, o_ref):
    """o = tanh(x @ w + b); one row tile per grid step (stage 1)."""
    y = jnp.dot(x_ref[...], w_ref[...], preferred_element_type=jnp.float32)
    o_ref[...] = jnp.tanh(y + b_ref[...]).astype(o_ref.dtype)


def _conv3_tanh_conv1_stats_kernel(x_ref, w2_ref, b2_ref, w3_ref, b3_ref,
                                   mask_ref, y_ref, stat_ref, *, ho, wp):
    """Fused stage 2+3 for one image.

    x_ref   : (1, Hp*Wp, C1p) bf16  flattened zero-padded image
    w2_ref  : (9, C1p, C2p)   bf16  per-tap 3x3 weights
    b2_ref  : (1, C2p)        f32
    w3_ref  : (C2p, C3p)      bf16  1x1 weights
    b3_ref  : (1, C3p)        f32
    mask_ref: (1, Ho*Wp, 1)   f32   1 for valid output columns, 0 for garbage
    y_ref   : (1, Ho*Wp, C3p) bf16  1x1-conv output (pre-BN)
    stat_ref: (1, 2, C3p)     f32   per-image partial (sum, sumsq)
    """
    rows = ho * wp
    c2 = w2_ref.shape[2]

    # Direct 3x3/s1/p1 conv: 9 statically shifted slices of the flat image.
    acc = jnp.zeros((rows, c2), jnp.float32)
    for di in range(3):
        for dj in range(3):
            off = di * wp + dj
            tap = x_ref[0, off:off + rows, :]                  # static slice
            acc = acc + jnp.dot(tap, w2_ref[di * 3 + dj],
                                preferred_element_type=jnp.float32)
    h = jnp.tanh(acc + b2_ref[...])                            # (rows, C2p) f32

    # Fused 1x1 conv (never leaves VMEM as a hidden-width tensor).
    y = jnp.dot(h.astype(jnp.bfloat16), w3_ref[...],
                preferred_element_type=jnp.float32) + b3_ref[...]
    y_ref[0, :, :] = y.astype(y_ref.dtype)

    # Per-image partial BN statistics over valid pixels only.
    ym = y * mask_ref[0]
    ssum = jnp.sum(ym, axis=0, keepdims=True)
    ssq = jnp.sum(ym * ym, axis=0, keepdims=True)
    stat_ref[0, :, :] = jnp.concatenate([ssum, ssq], axis=0)


def _bn_apply_kernel(y_ref, scale_ref, shift_ref, o_ref):
    """Pass 2 of BN: o = y * scale + shift (per channel)."""
    o_ref[...] = y_ref[...].astype(jnp.float32) * scale_ref[...] + shift_ref[...]


# ------------------------------------------------------------------ wrappers --

def _conv_as_matmul_tanh(cols, w_mat, b):
    """Tiled bf16 matmul + bias + tanh.  cols:(M,K) bf16 -> (M,Np) bf16."""
    m, k = cols.shape
    n = w_mat.shape[1]
    tm = _pick_tm(m)
    out = pl.pallas_call(
        _mm_bias_tanh_kernel,
        out_shape=jax.ShapeDtypeStruct((m, n), jnp.bfloat16),
        grid=(pl.cdiv(m, tm),),
        in_specs=[
            pl.BlockSpec((tm, k), lambda i: (i, 0)),
            pl.BlockSpec((k, n), lambda i: (0, 0)),
            pl.BlockSpec((1, n), lambda i: (0, 0)),
        ],
        out_specs=pl.BlockSpec((tm, n), lambda i: (i, 0)),
        compiler_params=pltpu.CompilerParams(
            dimension_semantics=("parallel",),
            vmem_limit_bytes=_VMEM_LIMIT,
        ),
        cost_estimate=pl.CostEstimate(
            flops=2 * m * k * n,
            transcendentals=m * n,
            bytes_accessed=m * k * 2 + k * n * 2 + m * n * 2,
        ),
    )(cols, w_mat, b)
    return out


def _conv3x3_tanh_conv1x1_stats(x_nhwc, w2_taps, b2, w3_mat, b3):
    """Fused 3x3 conv + tanh + 1x1 conv + BN partial stats, one image / step."""
    n, h, w, c1p = x_nhwc.shape
    c2p = w2_taps.shape[2]
    c3p = w3_mat.shape[1]
    ho, wo = h, w
    # Pad 1 top / 2 bottom / 1 left / 1 right: the extra bottom row keeps the
    # shifted flat slices in-bounds for the 2 garbage columns per output row.
    hp, wp = h + 3, w + 2
    xp = jnp.pad(x_nhwc, ((0, 0), (1, 2), (1, 1), (0, 0)))
    x_flat = xp.reshape(n, hp * wp, c1p)
    rows = ho * wp

    col_mask = (jnp.arange(wp) < wo).astype(jnp.float32)
    col_mask = jnp.broadcast_to(col_mask[None, :], (ho, wp)).reshape(1, rows, 1)

    kernel = functools.partial(_conv3_tanh_conv1_stats_kernel, ho=ho, wp=wp)
    flops = 2 * n * rows * 9 * c1p * c2p + 2 * n * rows * c2p * c3p
    y, stats = pl.pallas_call(
        kernel,
        out_shape=(jax.ShapeDtypeStruct((n, rows, c3p), jnp.bfloat16),
                   jax.ShapeDtypeStruct((n, 2, c3p), jnp.float32)),
        grid=(n,),
        in_specs=[
            pl.BlockSpec((1, hp * wp, c1p), lambda i: (i, 0, 0)),
            pl.BlockSpec((9, c1p, c2p), lambda i: (0, 0, 0)),
            pl.BlockSpec((1, c2p), lambda i: (0, 0)),
            pl.BlockSpec((c2p, c3p), lambda i: (0, 0)),
            pl.BlockSpec((1, c3p), lambda i: (0, 0)),
            pl.BlockSpec((1, rows, 1), lambda i: (0, 0, 0)),
        ],
        out_specs=(pl.BlockSpec((1, rows, c3p), lambda i: (i, 0, 0)),
                   pl.BlockSpec((1, 2, c3p), lambda i: (i, 0, 0))),
        compiler_params=pltpu.CompilerParams(
            dimension_semantics=("parallel",),     # per-image partial stats -> no race
            vmem_limit_bytes=_VMEM_LIMIT,
        ),
        cost_estimate=pl.CostEstimate(
            flops=flops,
            transcendentals=n * rows * c2p,
            bytes_accessed=(n * hp * wp * c1p * 2 + 9 * c1p * c2p * 2
                            + c2p * c3p * 2 + n * rows * c3p * 2),
        ),
    )(x_flat, w2_taps, b2, w3_mat, b3, col_mask)
    return y, stats, wp


def _bn_apply(y2d, scale, shift):
    """Tiled normalize: bf16 y in, f32 out."""
    m, c = y2d.shape
    tm = _pick_tm(m)
    return pl.pallas_call(
        _bn_apply_kernel,
        out_shape=jax.ShapeDtypeStruct((m, c), jnp.float32),
        grid=(pl.cdiv(m, tm),),
        in_specs=[
            pl.BlockSpec((tm, c), lambda i: (i, 0)),
            pl.BlockSpec((1, c), lambda i: (0, 0)),
            pl.BlockSpec((1, c), lambda i: (0, 0)),
        ],
        out_specs=pl.BlockSpec((tm, c), lambda i: (i, 0)),
        compiler_params=pltpu.CompilerParams(
            dimension_semantics=("parallel",),
            vmem_limit_bytes=_VMEM_LIMIT,
        ),
    )(y2d, scale.reshape(1, c), shift.reshape(1, c))


# -------------------------------------------------------------------- glue ---

def _im2col_nhwc(x, kh, kw, stride, pad):
    """x: (N, H, W, C) bf16 -> ((N*Ho*Wo, kh*kw*C), Ho, Wo). Pure indexing glue."""
    n, h, w, c = x.shape
    xp = jnp.pad(x, ((0, 0), (pad, pad), (pad, pad), (0, 0)))
    ho = (h + 2 * pad - kh) // stride + 1
    wo = (w + 2 * pad - kw) // stride + 1
    cols = []
    for i in range(kh):
        for j in range(kw):
            cols.append(xp[:, i:i + stride * ho:stride, j:j + stride * wo:stride, :])
    cols = jnp.stack(cols, axis=3)                 # (N, Ho, Wo, kh*kw, C)
    return cols.reshape(n * ho * wo, kh * kw * c), ho, wo


def _conv_weight_to_mat(w_oihw):
    """(Cout, Cin, KH, KW) torch layout -> (KH*KW*Cin, Cout) matmul layout."""
    co, ci, kh, kw = w_oihw.shape
    return jnp.transpose(w_oihw, (2, 3, 1, 0)).reshape(kh * kw * ci, co)


def init_encoder2_params(key, in_feat_dim, codebook_dim, hidden_dim):
    """Deterministic kaiming-uniform-style init (shapes match the nn.Module)."""
    def conv_init(k, cout, cin, kh, kw):
        k1, k2 = jax.random.split(k)
        fan_in = cin * kh * kw
        bound = 1.0 / jnp.sqrt(fan_in)
        w = jax.random.uniform(k1, (cout, cin, kh, kw), jnp.float32, -bound, bound)
        b = jax.random.uniform(k2, (cout,), jnp.float32, -bound, bound)
        return w, b

    k1, k2, k3 = jax.random.split(key, 3)
    h2 = hidden_dim // 2
    w1, b1 = conv_init(k1, h2, in_feat_dim, 7, 7)
    w2, b2 = conv_init(k2, hidden_dim, h2, 3, 3)
    w3, b3 = conv_init(k3, codebook_dim, hidden_dim, 1, 1)
    gamma = jnp.ones((codebook_dim,), jnp.float32)
    beta = jnp.zeros((codebook_dim,), jnp.float32)
    return dict(w1=w1, b1=b1, w2=w2, b2=b2, w3=w3, b3=b3, gamma=gamma, beta=beta)


def encoder2_forward(params, x_nchw):
    """Forward pass.  x_nchw: (N, Cin, H, W) -> (N, codebook_dim, Ho, Wo) float32."""
    x = x_nchw.astype(jnp.float32)
    n = x.shape[0]
    c1 = params["w1"].shape[0]      # hidden // 2
    c2 = params["w2"].shape[0]      # hidden
    c3 = params["w3"].shape[0]      # codebook_dim
    c1p = _round_up(c1, 128)
    c2p = _round_up(c2, 128)
    c3p = _round_up(c3, 128)

    x = jnp.transpose(x, (0, 2, 3, 1)).astype(jnp.bfloat16)   # NCHW -> NHWC bf16

    # ---- Stage 1: Conv2d(in, hidden//2, k=7, s=4, p=2) + Tanh -------------
    cols, ho, wo = _im2col_nhwc(x, 7, 7, stride=4, pad=2)
    w1 = _pad_last(_conv_weight_to_mat(params["w1"]), c1p).astype(jnp.bfloat16)
    b1 = _pad_last(params["b1"], c1p).reshape(1, c1p).astype(jnp.float32)
    a1 = _conv_as_matmul_tanh(cols, w1, b1)        # (N*Ho*Wo, c1p) bf16, pad ch == 0
    a1 = a1.reshape(n, ho, wo, c1p)

    # ---- Stage 2+3 fused: Conv3x3/p1 + Tanh + Conv1x1 + BN stats ----------
    w2_taps = jnp.transpose(params["w2"], (2, 3, 1, 0)).reshape(9, c1, c2)
    w2_taps = jnp.pad(w2_taps, ((0, 0), (0, c1p - c1), (0, c2p - c2))).astype(jnp.bfloat16)
    b2 = _pad_last(params["b2"], c2p).reshape(1, c2p).astype(jnp.float32)
    w3 = jnp.transpose(params["w3"].reshape(c3, c2), (1, 0))            # (c2, c3)
    w3 = jnp.pad(w3, ((0, c2p - c2), (0, c3p - c3))).astype(jnp.bfloat16)
    b3 = _pad_last(params["b3"], c3p).reshape(1, c3p).astype(jnp.float32)

    y, stats, wp = _conv3x3_tanh_conv1x1_stats(a1, w2_taps, b2, w3, b3)
    # y: (N, Ho*Wp, c3p) bf16 (Wp = Wo+2 includes 2 garbage cols/row, masked in stats)

    # ---- BatchNorm (training-mode batch stats, biased variance) -----------
    count = float(n * ho * wo)
    ssum = jnp.sum(stats[:, 0, :], axis=0)
    ssq = jnp.sum(stats[:, 1, :], axis=0)
    mean = ssum / count
    var = jnp.maximum(ssq / count - mean * mean, 0.0)   # clamp: avoid rsqrt(<0)
    inv = jax.lax.rsqrt(var + _EPS)
    scale = _pad_last(params["gamma"], c3p) * inv
    shift = _pad_last(params["beta"], c3p) - mean * scale

    out = _bn_apply(y.reshape(n * ho * wp, c3p),
                    scale.astype(jnp.float32), shift.astype(jnp.float32))
    out = out.reshape(n, ho, wp, c3p)[:, :, :wo, :c3]   # drop garbage cols + pad ch
    return jnp.transpose(out, (0, 3, 1, 2))             # NHWC -> NCHW


if __name__ == "__main__":
    # small shapes: batch=2, in_feat_dim=4, spatial=16, hidden_dim=32, codebook_dim=16
    IN_FEAT, CODEBOOK, HIDDEN = 4, 16, 32
    key = jax.random.PRNGKey(0)
    kp, kx = jax.random.split(key)
    params = init_encoder2_params(kp, IN_FEAT, CODEBOOK, HIDDEN)
    x = jax.random.normal(kx, (2, IN_FEAT, 16, 16), jnp.float32)

    out = jax.jit(encoder2_forward)(params, x)
    out = jax.block_until_ready(out)
    assert out.shape == (2, CODEBOOK, 4, 4), out.shape
    assert bool(jnp.all(jnp.isfinite(out)))
    print("KERNEL_OK")
</pallas_src>

<mosaic_0001>
module attributes {stable_mosaic.version = 11 : i64} {
  func.func @_mm_bias_tanh_kernel(%arg0: i32, %arg1: memref<32x196xbf16, #tpu.memory_space<vmem>>, %arg2: memref<196x128xbf16, #tpu.memory_space<vmem>>, %arg3: memref<1x128xf32, #tpu.memory_space<vmem>>, %arg4: memref<32x128xbf16, #tpu.memory_space<vmem>>) attributes {dimension_semantics = [#tpu.dimension_semantics<parallel>], iteration_bounds = array<i64: 1>, scalar_prefetch = 0 : i64, scratch_operands = 0 : i64, tpu.core_type = #tpu.core_type<tc>, window_params = [{transform_indices = @transform_0, window_bounds = array<i64: 32, 196>}, {pipeline_mode = #tpu.pipeline_mode<synchronous>, transform_indices = @transform_1, window_bounds = array<i64: 196, 128>}, {pipeline_mode = #tpu.pipeline_mode<synchronous>, transform_indices = @transform_2, window_bounds = array<i64: 1, 128>}, {transform_indices = @transform_3, window_bounds = array<i64: 32, 128>}]} {
    %c0 = arith.constant 0 : index
    %c0_0 = arith.constant 0 : index
    %0 = vector.load %arg1[%c0, %c0_0] : memref<32x196xbf16, #tpu.memory_space<vmem>>, vector<32x196xbf16>
    %c0_1 = arith.constant 0 : index
    %c0_2 = arith.constant 0 : index
    %1 = vector.load %arg2[%c0_1, %c0_2] : memref<196x128xbf16, #tpu.memory_space<vmem>>, vector<196x128xbf16>
    %cst = arith.constant dense<0.000000e+00> : vector<32x128xf32>
    %2 = tpu.matmul %0, %1, %cst {dimension_numbers = #tpu.dot_dimension_numbers<[1], [0], [0], [1], [0, 0, 1, 1], [], []>} : vector<32x196xbf16>, vector<196x128xbf16>, vector<32x128xf32> -> vector<32x128xf32>
    %c0_3 = arith.constant 0 : index
    %c0_4 = arith.constant 0 : index
    %3 = vector.load %arg3[%c0_3, %c0_4] : memref<1x128xf32, #tpu.memory_space<vmem>>, vector<1x128xf32>
    %4 = vector.broadcast %3 : vector<1x128xf32> to vector<32x128xf32>
    %5 = arith.addf %2, %4 : vector<32x128xf32>
    %6 = math.tanh %5 : vector<32x128xf32>
    %7 = arith.truncf %6 : vector<32x128xf32> to vector<32x128xbf16>
    %c0_5 = arith.constant 0 : index
    %c0_6 = arith.constant 0 : index
    %8 = vector.load %arg4[%c0_5, %c0_6] : memref<32x128xbf16, #tpu.memory_space<vmem>>, vector<32x128xbf16>
    tpu.vector_store %arg4[%c0_5, %c0_6], %7 {strides = array<i32>} : memref<32x128xbf16, #tpu.memory_space<vmem>>, vector<32x128xbf16>,
    return
  }
  func.func @transform_0(%arg0: i32) -> (i32, i32) {
    %c0_i32 = arith.constant 0 : i32
    %c0_i32_0 = arith.constant 0 : i32
    return %arg0, %c0_i32 : i32, i32
  }
  func.func @transform_1(%arg0: i32) -> (i32, i32) {
    %c0_i32 = arith.constant 0 : i32
    %c0_i32_0 = arith.constant 0 : i32
    %c0_i32_1 = arith.constant 0 : i32
    return %c0_i32, %c0_i32_0 : i32, i32
  }
  func.func @transform_2(%arg0: i32) -> (i32, i32) {
    %c0_i32 = arith.constant 0 : i32
    %c0_i32_0 = arith.constant 0 : i32
    %c0_i32_1 = arith.constant 0 : i32
    return %c0_i32, %c0_i32_0 : i32, i32
  }
  func.func @transform_3(%arg0: i32) -> (i32, i32) {
    %c0_i32 = arith.constant 0 : i32
    %c0_i32_0 = arith.constant 0 : i32
    return %arg0, %c0_i32 : i32, i32
  }
}

module attributes {stable_mosaic.version = 11 : i64} {
  func.func @_bn_apply_kernel(%arg0: i32, %arg1: memref<48x128xbf16, #tpu.memory_space<vmem>>, %arg2: memref<1x128xf32, #tpu.memory_space<vmem>>, %arg3: memref<1x128xf32, #tpu.memory_space<vmem>>, %arg4: memref<48x128xf32, #tpu.memory_space<vmem>>) attributes {dimension_semantics = [#tpu.dimension_semantics<parallel>], iteration_bounds = array<i64: 1>, scalar_prefetch = 0 : i64, scratch_operands = 0 : i64, tpu.core_type = #tpu.core_type<tc>, window_params = [{transform_indices = @transform_0, window_bounds = array<i64: 48, 128>}, {pipeline_mode = #tpu.pipeline_mode<synchronous>, transform_indices = @transform_1, window_bounds = array<i64: 1, 128>}, {pipeline_mode = #tpu.pipeline_mode<synchronous>, transform_indices = @transform_2, window_bounds = array<i64: 1, 128>}, {transform_indices = @transform_3, window_bounds = array<i64: 48, 128>}]} {
    %c0 = arith.constant 0 : index
    %c0_0 = arith.constant 0 : index
    %0 = vector.load %arg1[%c0, %c0_0] : memref<48x128xbf16, #tpu.memory_space<vmem>>, vector<48x128xbf16>
    %1 = arith.extf %0 : vector<48x128xbf16> to vector<48x128xf32>
    %c0_1 = arith.constant 0 : index
    %c0_2 = arith.constant 0 : index
    %2 = vector.load %arg2[%c0_1, %c0_2] : memref<1x128xf32, #tpu.memory_space<vmem>>, vector<1x128xf32>
    %3 = vector.broadcast %2 : vector<1x128xf32> to vector<48x128xf32>
    %4 = arith.mulf %1, %3 : vector<48x128xf32>
    %c0_3 = arith.constant 0 : index
    %c0_4 = arith.constant 0 : index
    %5 = vector.load %arg3[%c0_3, %c0_4] : memref<1x128xf32, #tpu.memory_space<vmem>>, vector<1x128xf32>
    %6 = vector.broadcast %5 : vector<1x128xf32> to vector<48x128xf32>
    %7 = arith.addf %4, %6 : vector<48x128xf32>
    %c0_5 = arith.constant 0 : index
    %c0_6 = arith.constant 0 : index
    %8 = vector.load %arg4[%c0_5, %c0_6] : memref<48x128xf32, #tpu.memory_space<vmem>>, vector<48x128xf32>
    tpu.vector_store %arg4[%c0_5, %c0_6], %7 {strides = array<i32>} : memref<48x128xf32, #tpu.memory_space<vmem>>, vector<48x128xf32>,
    return
  }
  func.func @transform_0(%arg0: i32) -> (i32, i32) {
    %c0_i32 = arith.constant 0 : i32
    %c0_i32_0 = arith.constant 0 : i32
    return %arg0, %c0_i32 : i32, i32
  }
  func.func @transform_1(%arg0: i32) -> (i32, i32) {
    %c0_i32 = arith.constant 0 : i32
    %c0_i32_0 = arith.constant 0 : i32
    %c0_i32_1 = arith.constant 0 : i32
    return %c0_i32, %c0_i32_0 : i32, i32
  }
  func.func @transform_2(%arg0: i32) -> (i32, i32) {
    %c0_i32 = arith.constant 0 : i32
    %c0_i32_0 = arith.constant 0 : i32
    %c0_i32_1 = arith.constant 0 : i32
    return %c0_i32, %c0_i32_0 : i32, i32
  }
  func.func @transform_3(%arg0: i32) -> (i32, i32) {
    %c0_i32 = arith.constant 0 : i32
    %c0_i32_0 = arith.constant 0 : i32
    return %arg0, %c0_i32 : i32, i32
  }
}

module attributes {stable_mosaic.version = 11 : i64} {
  func.func @_conv3_tanh_conv1_stats_kernel(%arg0: i32, %arg1: memref<1x42x128xbf16, #tpu.memory_space<vmem>>, %arg2: memref<9x128x128xbf16, #tpu.memory_space<vmem>>, %arg3: memref<1x128xf32, #tpu.memory_space<vmem>>, %arg4: memref<128x128xbf16, #tpu.memory_space<vmem>>, %arg5: memref<1x128xf32, #tpu.memory_space<vmem>>, %arg6: memref<1x24x1xf32, #tpu.memory_space<vmem>>, %arg7: memref<1x24x128xbf16, #tpu.memory_space<vmem>>, %arg8: memref<1x2x128xf32, #tpu.memory_space<vmem>>) attributes {dimension_semantics = [#tpu.dimension_semantics<parallel>], iteration_bounds = array<i64: 2>, scalar_prefetch = 0 : i64, scratch_operands = 0 : i64, tpu.core_type = #tpu.core_type<tc>, window_params = [{transform_indices = @transform_0, window_bounds = array<i64: 1, 42, 128>}, {pipeline_mode = #tpu.pipeline_mode<synchronous>, transform_indices = @transform_1, window_bounds = array<i64: 9, 128, 128>}, {pipeline_mode = #tpu.pipeline_mode<synchronous>, transform_indices = @transform_2, window_bounds = array<i64: 1, 128>}, {pipeline_mode = #tpu.pipeline_mode<synchronous>, transform_indices = @transform_3, window_bounds = array<i64: 128, 128>}, {pipeline_mode = #tpu.pipeline_mode<synchronous>, transform_indices = @transform_4, window_bounds = array<i64: 1, 128>}, {pipeline_mode = #tpu.pipeline_mode<synchronous>, transform_indices = @transform_5, window_bounds = array<i64: 1, 24, 1>}, {transform_indices = @transform_6, window_bounds = array<i64: 1, 24, 128>}, {transform_indices = @transform_7, window_bounds = array<i64: 1, 2, 128>}]} {
    %cst = arith.constant 0.000000e+00 : f32
    %0 = vector.broadcast %cst : f32 to vector<24x128xf32>
    %c0 = arith.constant 0 : index
    %c0_0 = arith.constant 0 : index
    %c0_1 = arith.constant 0 : index
    %1 = vector.load %arg1[%c0, %c0_0, %c0_1] : memref<1x42x128xbf16, #tpu.memory_space<vmem>>, vector<1x24x128xbf16>
    %2 = vector.shape_cast %1 : vector<1x24x128xbf16> to vector<24x128xbf16>
    %c0_2 = arith.constant 0 : index
    %c0_3 = arith.constant 0 : index
    %c0_4 = arith.constant 0 : index
    %3 = vector.load %arg2[%c0_2, %c0_3, %c0_4] : memref<9x128x128xbf16, #tpu.memory_space<vmem>>, vector<1x128x128xbf16>
    %4 = vector.shape_cast %3 : vector<1x128x128xbf16> to vector<128x128xbf16>
    %cst_5 = arith.constant dense<0.000000e+00> : vector<24x128xf32>
    %5 = tpu.matmul %2, %4, %cst_5 {dimension_numbers = #tpu.dot_dimension_numbers<[1], [0], [0], [1], [0, 0, 1, 1], [], []>} : vector<24x128xbf16>, vector<128x128xbf16>, vector<24x128xf32> -> vector<24x128xf32>
    %6 = arith.addf %0, %5 : vector<24x128xf32>
    %c0_6 = arith.constant 0 : index
    %c1 = arith.constant 1 : index
    %c0_7 = arith.constant 0 : index
    %7 = vector.load %arg1[%c0_6, %c1, %c0_7] : memref<1x42x128xbf16, #tpu.memory_space<vmem>>, vector<1x24x128xbf16>
    %8 = vector.shape_cast %7 : vector<1x24x128xbf16> to vector<24x128xbf16>
    %c1_8 = arith.constant 1 : index
    %c0_9 = arith.constant 0 : index
    %c0_10 = arith.constant 0 : index
    %9 = vector.load %arg2[%c1_8, %c0_9, %c0_10] : memref<9x128x128xbf16, #tpu.memory_space<vmem>>, vector<1x128x128xbf16>
    %10 = vector.shape_cast %9 : vector<1x128x128xbf16> to vector<128x128xbf16>
    %cst_11 = arith.constant dense<0.000000e+00> : vector<24x128xf32>
    %11 = tpu.matmul %8, %10, %cst_11 {dimension_numbers = #tpu.dot_dimension_numbers<[1], [0], [0], [1], [0, 0, 1, 1], [], []>} : vector<24x128xbf16>, vector<128x128xbf16>, vector<24x128xf32> -> vector<24x128xf32>
    %12 = arith.addf %6, %11 : vector<24x128xf32>
    %c0_12 = arith.constant 0 : index
    %c2 = arith.constant 2 : index
    %c0_13 = arith.constant 0 : index
    %13 = vector.load %arg1[%c0_12, %c2, %c0_13] : memref<1x42x128xbf16, #tpu.memory_space<vmem>>, vector<1x24x128xbf16>
    %14 = vector.shape_cast %13 : vector<1x24x128xbf16> to vector<24x128xbf16>
    %c2_14 = arith.constant 2 : index
    %c0_15 = arith.constant 0 : index
    %c0_16 = arith.constant 0 : index
    %15 = vector.load %arg2[%c2_14, %c0_15, %c0_16] : memref<9x128x128xbf16, #tpu.memory_space<vmem>>, vector<1x128x128xbf16>
    %16 = vector.shape_cast %15 : vector<1x128x128xbf16> to vector<128x128xbf16>
    %cst_17 = arith.constant dense<0.000000e+00> : vector<24x128xf32>
    %17 = tpu.matmul %14, %16, %cst_17 {dimension_numbers = #tpu.dot_dimension_numbers<[1], [0], [0], [1], [0, 0, 1, 1], [], []>} : vector<24x128xbf16>, vector<128x128xbf16>, vector<24x128xf32> -> vector<24x128xf32>
    %18 = arith.addf %12, %17 : vector<24x128xf32>
    %c0_18 = arith.constant 0 : index
    %c6 = arith.constant 6 : index
    %c0_19 = arith.constant 0 : index
    %19 = vector.load %arg1[%c0_18, %c6, %c0_19] : memref<1x42x128xbf16, #tpu.memory_space<vmem>>, vector<1x24x128xbf16>
    %20 = vector.shape_cast %19 : vector<1x24x128xbf16> to vector<24x128xbf16>
    %c3 = arith.constant 3 : index
    %c0_20 = arith.constant 0 : index
    %c0_21 = arith.constant 0 : index
    %21 = vector.load %arg2[%c3, %c0_20, %c0_21] : memref<9x128x128xbf16, #tpu.memory_space<vmem>>, vector<1x128x128xbf16>
    %22 = vector.shape_cast %21 : vector<1x128x128xbf16> to vector<128x128xbf16>
    %cst_22 = arith.constant dense<0.000000e+00> : vector<24x128xf32>
    %23 = tpu.matmul %20, %22, %cst_22 {dimension_numbers = #tpu.dot_dimension_numbers<[1], [0], [0], [1], [0, 0, 1, 1], [], []>} : vector<24x128xbf16>, vector<128x128xbf16>, vector<24x128xf32> -> vector<24x128xf32>
    %24 = arith.addf %18, %23 : vector<24x128xf32>
    %c0_23 = arith.constant 0 : index
    %c7 = arith.constant 7 : index
    %c0_24 = arith.constant 0 : index
    %25 = vector.load %arg1[%c0_23, %c7, %c0_24] : memref<1x42x128xbf16, #tpu.memory_space<vmem>>, vector<1x24x128xbf16>
    %26 = vector.shape_cast %25 : vector<1x24x128xbf16> to vector<24x128xbf16>
    %c4 = arith.constant 4 : index
    %c0_25 = arith.constant 0 : index
    %c0_26 = arith.constant 0 : index
    %27 = vector.load %arg2[%c4, %c0_25, %c0_26] : memref<9x128x128xbf16, #tpu.memory_space<vmem>>, vector<1x128x128xbf16>
    %28 = vector.shape_cast %27 : vector<1x128x128xbf16> to vector<128x128xbf16>
    %cst_27 = arith.constant dense<0.000000e+00> : vector<24x128xf32>
    %29 = tpu.matmul %26, %28, %cst_27 {dimension_numbers = #tpu.dot_dimension_numbers<[1], [0], [0], [1], [0, 0, 1, 1], [], []>} : vector<24x128xbf16>, vector<128x128xbf16>, vector<24x128xf32> -> vector<24x128xf32>
    %30 = arith.addf %24, %29 : vector<24x128xf32>
    %c0_28 = arith.constant 0 : index
    %c8 = arith.constant 8 : index
    %c0_29 = arith.constant 0 : index
    %31 = vector.load %arg1[%c0_28, %c8, %c0_29] : memref<1x42x128xbf16, #tpu.memory_space<vmem>>, vector<1x24x128xbf16>
    %32 = vector.shape_cast %31 : vector<1x24x128xbf16> to vector<24x128xbf16>
    %c5 = arith.constant 5 : index
    %c0_30 = arith.constant 0 : index
    %c0_31 = arith.constant 0 : index
    %33 = vector.load %arg2[%c5, %c0_30, %c0_31] : memref<9x128x128xbf16, #tpu.memory_space<vmem>>, vector<1x128x128xbf16>
    %34 = vector.shape_cast %33 : vector<1x128x128xbf16> to vector<128x128xbf16>
    %cst_32 = arith.constant dense<0.000000e+00> : vector<24x128xf32>
    %35 = tpu.matmul %32, %34, %cst_32 {dimension_numbers = #tpu.dot_dimension_numbers<[1], [0], [0], [1], [0, 0, 1, 1], [], []>} : vector<24x128xbf16>, vector<128x128xbf16>, vector<24x128xf32> -> vector<24x128xf32>
    %36 = arith.addf %30, %35 : vector<24x128xf32>
    %c0_33 = arith.constant 0 : index
    %c12 = arith.constant 12 : index
    %c0_34 = arith.constant 0 : index
    %37 = vector.load %arg1[%c0_33, %c12, %c0_34] : memref<1x42x128xbf16, #tpu.memory_space<vmem>>, vector<1x24x128xbf16>
    %38 = vector.shape_cast %37 : vector<1x24x128xbf16> to vector<24x128xbf16>
    %c6_35 = arith.constant 6 : index
    %c0_36 = arith.constant 0 : index
    %c0_37 = arith.constant 0 : index
    %39 = vector.load %arg2[%c6_35, %c0_36, %c0_37] : memref<9x128x128xbf16, #tpu.memory_space<vmem>>, vector<1x128x128xbf16>
    %40 = vector.shape_cast %39 : vector<1x128x128xbf16> to vector<128x128xbf16>
    %cst_38 = arith.constant dense<0.000000e+00> : vector<24x128xf32>
    %41 = tpu.matmul %38, %40, %cst_38 {dimension_numbers = #tpu.dot_dimension_numbers<[1], [0], [0], [1], [0, 0, 1, 1], [], []>} : vector<24x128xbf16>, vector<128x128xbf16>, vector<24x128xf32> -> vector<24x128xf32>
    %42 = arith.addf %36, %41 : vector<24x128xf32>
    %c0_39 = arith.constant 0 : index
    %c13 = arith.constant 13 : index
    %c0_40 = arith.constant 0 : index
    %43 = vector.load %arg1[%c0_39, %c13, %c0_40] : memref<1x42x128xbf16, #tpu.memory_space<vmem>>, vector<1x24x128xbf16>
    %44 = vector.shape_cast %43 : vector<1x24x128xbf16> to vector<24x128xbf16>
    %c7_41 = arith.constant 7 : index
    %c0_42 = arith.constant 0 : index
    %c0_43 = arith.constant 0 : index
    %45 = vector.load %arg2[%c7_41, %c0_42, %c0_43] : memref<9x128x128xbf16, #tpu.memory_space<vmem>>, vector<1x128x128xbf16>
    %46 = vector.shape_cast %45 : vector<1x128x128xbf16> to vector<128x128xbf16>
    %cst_44 = arith.constant dense<0.000000e+00> : vector<24x128xf32>
    %47 = tpu.matmul %44, %46, %cst_44 {dimension_numbers = #tpu.dot_dimension_numbers<[1], [0], [0], [1], [0, 0, 1, 1], [], []>} : vector<24x128xbf16>, vector<128x128xbf16>, vector<24x128xf32> -> vector<24x128xf32>
    %48 = arith.addf %42, %47 : vector<24x128xf32>
    %c0_45 = arith.constant 0 : index
    %c14 = arith.constant 14 : index
    %c0_46 = arith.constant 0 : index
    %49 = vector.load %arg1[%c0_45, %c14, %c0_46] : memref<1x42x128xbf16, #tpu.memory_space<vmem>>, vector<1x24x128xbf16>
    %50 = vector.shape_cast %49 : vector<1x24x128xbf16> to vector<24x128xbf16>
    %c8_47 = arith.constant 8 : index
    %c0_48 = arith.constant 0 : index
    %c0_49 = arith.constant 0 : index
    %51 = vector.load %arg2[%c8_47, %c0_48, %c0_49] : memref<9x128x128xbf16, #tpu.memory_space<vmem>>, vector<1x128x128xbf16>
    %52 = vector.shape_cast %51 : vector<1x128x128xbf16> to vector<128x128xbf16>
    %cst_50 = arith.constant dense<0.000000e+00> : vector<24x128xf32>
    %53 = tpu.matmul %50, %52, %cst_50 {dimension_numbers = #tpu.dot_dimension_numbers<[1], [0], [0], [1], [0, 0, 1, 1], [], []>} : vector<24x128xbf16>, vector<128x128xbf16>, vector<24x128xf32> -> vector<24x128xf32>
    %54 = arith.addf %48, %53 : vector<24x128xf32>
    %c0_51 = arith.constant 0 : index
    %c0_52 = arith.constant 0 : index
    %55 = vector.load %arg3[%c0_51, %c0_52] : memref<1x128xf32, #tpu.memory_space<vmem>>, vector<1x128xf32>
    %56 = vector.broadcast %55 : vector<1x128xf32> to vector<24x128xf32>
    %57 = arith.addf %54, %56 : vector<24x128xf32>
    %58 = math.tanh %57 : vector<24x128xf32>
    %59 = arith.truncf %58 : vector<24x128xf32> to vector<24x128xbf16>
    %c0_53 = arith.constant 0 : index
    %c0_54 = arith.constant 0 : index
    %60 = vector.load %arg4[%c0_53, %c0_54] : memref<128x128xbf16, #tpu.memory_space<vmem>>, vector<128x128xbf16>
    %cst_55 = arith.constant dense<0.000000e+00> : vector<24x128xf32>
    %61 = tpu.matmul %59, %60, %cst_55 {dimension_numbers = #tpu.dot_dimension_numbers<[1], [0], [0], [1], [0, 0, 1, 1], [], []>} : vector<24x128xbf16>, vector<128x128xbf16>, vector<24x128xf32> -> vector<24x128xf32>
    %c0_56 = arith.constant 0 : index
    %c0_57 = arith.constant 0 : index
    %62 = vector.load %arg5[%c0_56, %c0_57] : memref<1x128xf32, #tpu.memory_space<vmem>>, vector<1x128xf32>
    %63 = vector.broadcast %62 : vector<1x128xf32> to vector<24x128xf32>
    %64 = arith.addf %61, %63 : vector<24x128xf32>
    %65 = arith.truncf %64 : vector<24x128xf32> to vector<24x128xbf16>
    %c0_58 = arith.constant 0 : index
    %c0_59 = arith.constant 0 : index
    %c0_60 = arith.constant 0 : index
    %66 = vector.load %arg7[%c0_58, %c0_59, %c0_60] : memref<1x24x128xbf16, #tpu.memory_space<vmem>>, vector<1x24x128xbf16>
    %67 = vector.shape_cast %66 : vector<1x24x128xbf16> to vector<24x128xbf16>
    %68 = vector.shape_cast %65 : vector<24x128xbf16> to vector<1x24x128xbf16>
    tpu.vector_store %arg7[%c0_58, %c0_59, %c0_60], %68 {strides = array<i32>} : memref<1x24x128xbf16, #tpu.memory_space<vmem>>, vector<1x24x128xbf16>,
    %c0_61 = arith.constant 0 : index
    %c0_62 = arith.constant 0 : index
    %c0_63 = arith.constant 0 : index
    %69 = vector.load %arg6[%c0_61, %c0_62, %c0_63] : memref<1x24x1xf32, #tpu.memory_space<vmem>>, vector<1x24x1xf32>
    %70 = vector.shape_cast %69 : vector<1x24x1xf32> to vector<24x1xf32>
    %71 = vector.broadcast %70 : vector<24x1xf32> to vector<24x128xf32>
    %72 = arith.mulf %64, %71 : vector<24x128xf32>
    %cst_64 = arith.constant dense<0.000000e+00> : vector<128xf32>
    %73 = vector.multi_reduction <add>, %72, %cst_64 [0] : vector<24x128xf32> to vector<128xf32>
    %74 = vector.shape_cast %73 : vector<128xf32> to vector<1x128xf32>
    %75 = arith.mulf %72, %72 : vector<24x128xf32>
    %cst_65 = arith.constant dense<0.000000e+00> : vector<128xf32>
    %76 = vector.multi_reduction <add>, %75, %cst_65 [0] : vector<24x128xf32> to vector<128xf32>
    %77 = vector.shape_cast %76 : vector<128xf32> to vector<1x128xf32>
    %78 = tpu.concatenate %74, %77 in 0 : vector<1x128xf32>, vector<1x128xf32> -> vector<2x128xf32>
    %c0_66 = arith.constant 0 : index
    %c0_67 = arith.constant 0 : index
    %c0_68 = arith.constant 0 : index
    %79 = vector.load %arg8[%c0_66, %c0_67, %c0_68] : memref<1x2x128xf32, #tpu.memory_space<vmem>>, vector<1x2x128xf32>
    %80 = vector.shape_cast %79 : vector<1x2x128xf32> to vector<2x128xf32>
    %81 = vector.shape_cast %78 : vector<2x128xf32> to vector<1x2x128xf32>
    tpu.vector_store %arg8[%c0_66, %c0_67, %c0_68], %81 {strides = array<i32>} : memref<1x2x128xf32, #tpu.memory_space<vmem>>, vector<1x2x128xf32>,
    return
  }
  func.func @transform_0(%arg0: i32) -> (i32, i32, i32) {
    %c0_i32 = arith.constant 0 : i32
    %c0_i32_0 = arith.constant 0 : i32
    %c0_i32_1 = arith.constant 0 : i32
    return %arg0, %c0_i32, %c0_i32_0 : i32, i32, i32
  }
  func.func @transform_1(%arg0: i32) -> (i32, i32, i32) {
    %c0_i32 = arith.constant 0 : i32
    %c0_i32_0 = arith.constant 0 : i32
    %c0_i32_1 = arith.constant 0 : i32
    %c0_i32_2 = arith.constant 0 : i32
    return %c0_i32, %c0_i32_0, %c0_i32_1 : i32, i32, i32
  }
  func.func @transform_2(%arg0: i32) -> (i32, i32) {
    %c0_i32 = arith.constant 0 : i32
    %c0_i32_0 = arith.constant 0 : i32
    %c0_i32_1 = arith.constant 0 : i32
    return %c0_i32, %c0_i32_0 : i32, i32
  }
  func.func @transform_3(%arg0: i32) -> (i32, i32) {
    %c0_i32 = arith.constant 0 : i32
    %c0_i32_0 = arith.constant 0 : i32
    %c0_i32_1 = arith.constant 0 : i32
    return %c0_i32, %c0_i32_0 : i32, i32
  }
  func.func @transform_4(%arg0: i32) -> (i32, i32) {
    %c0_i32 = arith.constant 0 : i32
    %c0_i32_0 = arith.constant 0 : i32
    %c0_i32_1 = arith.constant 0 : i32
    return %c0_i32, %c0_i32_0 : i32, i32
  }
  func.func @transform_5(%arg0: i32) -> (i32, i32, i32) {
    %c0_i32 = arith.constant 0 : i32
    %c0_i32_0 = arith.constant 0 : i32
    %c0_i32_1 = arith.constant 0 : i32
    %c0_i32_2 = arith.constant 0 : i32
    return %c0_i32, %c0_i32_0, %c0_i32_1 : i32, i32, i32
  }
  func.func @transform_6(%arg0: i32) -> (i32, i32, i32) {
    %c0_i32 = arith.constant 0 : i32
    %c0_i32_0 = arith.constant 0 : i32
    %c0_i32_1 = arith.constant 0 : i32
    return %arg0, %c0_i32, %c0_i32_0 : i32, i32, i32
  }
  func.func @transform_7(%arg0: i32) -> (i32, i32, i32) {
    %c0_i32 = arith.constant 0 : i32
    %c0_i32_0 = arith.constant 0 : i32
    %c0_i32_1 = arith.constant 0 : i32
    return %arg0, %c0_i32, %c0_i32_0 : i32, i32, i32
  }
}

</mosaic_0001>

<bundles_post_ra>
// kernel: encoder2_forward.3
= control target key start
LH: loop header
LB: loop body
LE: loop exit
PB: predicated region body
PF: predicated region fallthrough
CT: control target
= control target key end

     0   :  { %vm148_vm0 = vcmask 1041408   ;;  %vm141_vm1 = vcmask 556032   ;;  %s413_s1 = inlined_call_operand.vmem [shape: bf16[196,128], index: 1, kind: input, shape index: {}]   ;;  %s414_s2 = inlined_call_operand.vmem [shape: f32[1,128], index: 2, kind: input, shape index: {}]   ;;  %s415_s0 = inlined_call_operand.vmem [shape: bf16[32,196], index: 0, kind: input, shape index: {}]   ;;  %s416_s3 = inlined_call_operand.vmem [shape: bf16[32,128], index: 3, kind: output, shape index: {}]  }
   0x1   :  { %v283_v0 = vld [vmem:[%s413_s1 + $0x38] sm:$0xff]  ;;  %v43_v1 = vld [vmem:[%s413_s1 + $0x60] sm:$0x3]  ;;  %v282_v3 = vld [vmem:[%s413_s1 + $0x30] sm:$0xff] }
   0x2   :  { %v115_v2 = vunpack.c.l.b16 %v43_v1  ;;  %152 = vmatpush.bf16.msra.mxu0 %v283_v0  ;;  %299 = vmatpush.bf16.msra.mxu2 %v283_v0  ;;  %v281_v6 = vld [vmem:[%s413_s1 + $0x28] sm:$0xff]  ;;  %v287_v7 = vld [vmem:[%s413_s1 + $0x58] sm:$0xff]  ;;  %v280_v8 = vld [vmem:[%s413_s1 + $0x20] sm:$0xff] }
   0x3   :  { %v286_v9 = vld [vmem:[%s413_s1 + $0x50] sm:$0xff]  ;;  %v279_v10 = vld [vmem:[%s413_s1 + $0x18] sm:$0xff]  ;;  %v285_v11 = vld [vmem:[%s413_s1 + $0x48] sm:$0xff] }
   0x4   :  { %v128_v4 = vpack.c.b16 %v115_v2, %v115_v2  ;;  %v278_v12 = vld [vmem:[%s413_s1 + $0x10] sm:$0xff]  ;;  %v284_v13 = vld [vmem:[%s413_s1 + $0x40] sm:$0xff]  ;;  %v218_v15 = vld [vmem:[%s415_s0 + $0x18] sm:$0xf0] }
   0x5   :  { %v274_v14 = vld [vmem:[%s415_s0 + $0x14] sm:$0xf]  ;;  %v272_v16 = vld [vmem:[%s415_s0 + $0x4] sm:$0xf]  ;;  %v210_v17 = vld [vmem:[%s415_s0 + $0x8] sm:$0xf0] }
   0x6   :  { %v150_v5 = vsel %vm148_vm0, %v128_v4, 0  ;;  %153 = vmatpush.bf16.msra.mxu0 %v282_v3  ;;  %300 = vmatpush.bf16.msra.mxu2 %v282_v3  ;;  %v277_v18 = vld [vmem:[%s413_s1 + $0x8] sm:$0xff]  ;;  %v221_v19 = vor.u32 %v274_v14, %v218_v15  ;;  %v213_v20 = vor.u32 %v272_v16, %v210_v17  ;;  %v276_v21 = vld [vmem:[%s413_s1] sm:$0xff]  ;;  %v216_v24 = vld [vmem:[%s415_s0 + $0x10] sm:$0xf] }
   0x7   :  { %307 = vmatpush.bf16.msra.mxu3 %v150_v5  ;;  %174 = vmatpush.bf16.msra.mxu1 %v150_v5  ;;  %v208_v22 = vld [vmem:[%s415_s0] sm:$0xf]  ;;  %v273_v23 = vld [vmem:[%s415_s0 + $0x4] sm:$0xf0]  ;;  %v275_v25 = vld [vmem:[%s415_s0 + $0x14] sm:$0xf0] }
   0x8   :  { %v209_v26 = vor.u32 %v273_v23, %v208_v22  ;;  %v217_v27 = vor.u32 %v275_v25, %v216_v24  ;;  %v312_v28 = vld [vmem:[%s414_s2] ss:$0 sm:$0xff] }
   0xa   :  { %154 = vmatpush.bf16.msra.mxu0 %v281_v6  ;;  %301 = vmatpush.bf16.msra.mxu2 %v281_v6 }
   0xb   :  { %308 = vmatpush.bf16.msra.mxu3 %v287_v7  ;;  %175 = vmatpush.bf16.msra.mxu1 %v287_v7 }
   0xe   :  { %155 = vmatpush.bf16.msra.mxu0 %v280_v8  ;;  %302 = vmatpush.bf16.msra.mxu2 %v280_v8 }
   0xf   :  { %309 = vmatpush.bf16.msra.mxu3 %v286_v9  ;;  %176 = vmatpush.bf16.msra.mxu1 %v286_v9 }
  0x12   :  { %156 = vmatpush.bf16.msra.mxu0 %v279_v10  ;;  %303 = vmatpush.bf16.msra.mxu2 %v279_v10 }
  0x13   :  { %310 = vmatpush.bf16.msra.mxu3 %v285_v11  ;;  %177 = vmatpush.bf16.msra.mxu1 %v285_v11 }
  0x16   :  { %157 = vmatpush.bf16.msra.mxu0 %v278_v12  ;;  %304 = vmatpush.bf16.msra.mxu2 %v278_v12 }
  0x17   :  { %311 = vmatpush.bf16.msra.mxu3 %v284_v13  ;;  %178 = vmatpush.bf16.msra.mxu1 %v284_v13 }
  0x1a   :  { %158 = vmatpush.bf16.msra.mxu0 %v277_v18  ;;  %305 = vmatpush.bf16.msra.mxu2 %v277_v18 }
  0x1b   :  { %271 = vmatmul.msk.bf16.vlgmr.msra.gmra.mxu3 %vm141_vm1, %v221_v19  ;;  %270 = vmatmul.msk.bf16.vlgmr.msra.gmra.mxu1 %vm141_vm1, %v213_v20 }
  0x1e   :  { %159 = vmatpush.bf16.msra.mxu0 %v276_v21  ;;  %306 = vmatpush.bf16.msra.mxu2 %v276_v21 }
  0x21   :  { %160 = vmatmul.bf16.vlgmr.msra.gmra.mxu0 %v209_v26  ;;  %165 = vmatmul.bf16.vlgmr.msra.gmra.mxu2 %v217_v27 }
  0x98   :  { %v180_v30 = vpop.f32.mrf.mxu1 }
  0x9e   :  { %v161_v29 = vpop.f32.mrf.mxu0  ;;  %v185_v32 = vpop.f32.mrf.mxu3 }
  0x9f   :  { %v162_v31 = vadd.f32 %v312_v28, %v161_v29 }
  0xa0   :  { %v182_v38 = vpop.f32.mrf.mxu1 }
  0xa1   :  { %v181_v34 = vadd.f32 %v180_v30, %v162_v31 }
  0xa3   :  { %313 = vtanh.f32 %v181_v34 }
  0xa4   :  { %v166_v33 = vpop.f32.mrf.mxu2 }
  0xa5   :  { %v167_v37 = vadd.f32 %v312_v28, %v166_v33 }
  0xa6   :  { %v163_v35 = vpop.f32.mrf.mxu0  ;;  %v187_v43 = vpop.f32.mrf.mxu3 }
  0xa7   :  { %v164_v36 = vadd.f32 %v312_v28, %v163_v35  ;;  %v186_v40 = vadd.f32 %v185_v32, %v167_v37 }
  0xa9   :  { %v183_v39 = vadd.f32 %v182_v38, %v164_v36  ;;  %v314_v45 = vpop.eup %313 }
  0xab   :  { %315 = vtanh.f32 %v183_v39 }
  0xac   :  { %v168_v41 = vpop.f32.mrf.mxu2  ;;  %317 = vtanh.f32 %v186_v40 }
  0xad   :  { %v169_v42 = vadd.f32 %v312_v28, %v168_v41 }
  0xaf   :  { %v188_v44 = vadd.f32 %v187_v43, %v169_v42 }
  0xb1   :  { %v316_v46 = vpop.eup %315  ;;  %319 = vtanh.f32 %v188_v44 }
  0xb2   :  { %v291_v47 = vpack.c.bf16 %v316_v46, %v314_v45  ;;  %v318_v48 = vpop.eup %317 }
  0xb4   :  { %292 = vst [vmem:[%s416_s3] sm:$0xff] %v291_v47  }
  0xb7   :  { %v320_v49 = vpop.eup %319 }
  0xb8   :  { %v296_v50 = vpack.c.bf16 %v320_v49, %v318_v48 }
  0xba   :  { %298 = vst [vmem:[%s416_s3 + $0x8] sm:$0xff] %v296_v50  }

// kernel: encoder2_forward.5
= control target key start
LH: loop header
LB: loop body
LE: loop exit
PB: predicated region body
PF: predicated region fallthrough
CT: control target
= control target key end

     0   :  { %s125_s0 = inlined_call_operand.vmem [shape: bf16[48,128], index: 0, kind: input, shape index: {}]   ;;  %s126_s1 = inlined_call_operand.vmem [shape: f32[1,128], index: 1, kind: input, shape index: {}]   ;;  %s127_s2 = inlined_call_operand.vmem [shape: f32[1,128], index: 2, kind: input, shape index: {}]   ;;  %s128_s3 = inlined_call_operand.vmem [shape: f32[48,128], index: 3, kind: output, shape index: {}]  }
   0x1   :  { %v57_v0 = vld [vmem:[%s125_s0] sm:$0xff]   ;;  %v68_v5 = vld [vmem:[%s125_s0 + $0x8] sm:$0xff]   ;;  %v69_v8 = vld [vmem:[%s125_s0 + $0x10] sm:$0xff]  }
   0x2   :  { %v70_v1 = vld [vmem:[%s126_s1] ss:$0 sm:$0xff]  ;;  %v58_v2 = vunpack.c.l.bf16 %v57_v0  ;;  %v59_v4 = vunpack.c.h.bf16 %v57_v0  ;;  %v62_v6 = vunpack.c.l.bf16 %v68_v5  ;;  %v63_v7 = vunpack.c.h.bf16 %v68_v5 }
   0x3   :  { %v71_v3 = vld [vmem:[%s127_s2] ss:$0 sm:$0xff]  ;;  %v66_v11 = vunpack.c.l.bf16 %v69_v8  ;;  %v67_v12 = vunpack.c.h.bf16 %v69_v8 }
   0x4   :  { %v30_v9 = vmul.f32 %v70_v1, %v58_v2  ;;  %v31_v10 = vmul.f32 %v70_v1, %v59_v4  ;;  %v32_v13 = vmul.f32 %v70_v1, %v62_v6  ;;  %v33_v14 = vmul.f32 %v70_v1, %v63_v7 }
   0x5   :  { %v34_v17 = vmul.f32 %v70_v1, %v66_v11  ;;  %v35_v18 = vmul.f32 %v70_v1, %v67_v12 }
   0x6   :  { %v40_v15 = vadd.f32 %v71_v3, %v30_v9  ;;  %v41_v16 = vadd.f32 %v71_v3, %v31_v10  ;;  %v42_v19 = vadd.f32 %v71_v3, %v32_v13  ;;  %v43_v20 = vadd.f32 %v71_v3, %v33_v14 }
   0x7   :  { %v44_v21 = vadd.f32 %v71_v3, %v34_v17  ;;  %v45_v22 = vadd.f32 %v71_v3, %v35_v18 }
   0x8   :  { %46 = vst [vmem:[%s128_s3] sm:$0xff] %v40_v15 }
   0x9   :  { %47 = vst [vmem:[%s128_s3 + $0x8] sm:$0xff] %v41_v16 }
   0xa   :  { %48 = vst [vmem:[%s128_s3 + $0x10] sm:$0xff] %v42_v19 }
   0xb   :  { %49 = vst [vmem:[%s128_s3 + $0x18] sm:$0xff] %v43_v20 }
   0xc   :  { %50 = vst [vmem:[%s128_s3 + $0x20] sm:$0xff] %v44_v21 }
   0xd   :  { %51 = vst [vmem:[%s128_s3 + $0x28] sm:$0xff] %v45_v22 }

// kernel: encoder2_forward.4
= control target key start
LH: loop header
LB: loop body
LE: loop exit
PB: predicated region body
PF: predicated region fallthrough
CT: control target
= control target key end

     0   :  { %s2068_s24 = smov 0   ;;  %s2437_s0 = inlined_call_operand.vmem [shape: bf16[2,42,128], index: 0, kind: input, shape index: {}]   ;;  %s2438_s1 = inlined_call_operand.vmem [shape: bf16[9,128,128], index: 1, kind: input, shape index: {}]   ;;  %s2439_s2 = inlined_call_operand.vmem [shape: f32[1,128], index: 2, kind: input, shape index: {}]   ;;  %s2440_s3 = inlined_call_operand.vmem [shape: bf16[128,128], index: 3, kind: input, shape index: {}]   ;;  %s2441_s4 = inlined_call_operand.vmem [shape: f32[1,128], index: 4, kind: input, shape index: {}]   ;;  %s2442_s5 = inlined_call_operand.vmem [shape: f32[1,24,1], index: 5, kind: input, shape index: {}]   ;;  %s2443_s6 = inlined_call_operand.vmem [shape: bf16[2,24,128], index: 6, kind: output, shape index: {0}]   ;;  %s2444_s7 = inlined_call_operand.vmem [shape: f32[2,2,128], index: 7, kind: output, shape index: {1}]  }
   0x1 LB: > { %s1430_s25 = sadd.s32 4294967295, %s2025_s24   ;;  %p1434_p0 = scmp.ge.s32.totalorder %s2025_s24, 1  ;;  %s2025_s24 = sphi %s2068_s24, %s18_s24  }
   0x2   : > { %p240_p1 = scmp.lt.s32.totalorder %s2025_s24, 3 }
   0x4   : > { %p241_p2 = pnand %p1434_p0, %p240_p1 }
   0x5   : > { %p276_p3 = scmp.lt.s32.totalorder (!%p241_p2), %s1430_s25, 1 }
   0x6   : > { %244 = sbr.rel (%p241_p2) target bundleno = 413 (0x19d), region = 44 }
   0xb   : > { %v1903_v0 = vld [vmem:[%s2438_s1 + $0x78] sm:$0xff]  ;;  %v1902_v4 = vld [vmem:[%s2438_s1 + $0x70] sm:$0xff]  ;;  %s2446_s25 = smov (!%p276_p3, %s1430_s25), 1  ;;  %v1901_v8 = vld [vmem:[%s2438_s1 + $0x68] sm:$0xff]  ;;  %vm337_vm0 = vsmask.f32 7424 }
   0xc   : > { %v1895_v1 = vld [vmem:[%s2438_s1 + $0x38] sm:$0xff]  ;;  %403 = vmatpush.bf16.msra.mxu0 %v1903_v0  ;;  %v1894_v5 = vld [vmem:[%s2438_s1 + $0x30] sm:$0xff]  ;;  %s1998_s19 = smul.u32 24, %s2446_s25  ;;  %v1893_v9 = vld [vmem:[%s2438_s1 + $0x28] sm:$0xff]  ;;  %vm511_vm1 = vcmask 1046528   ;;  %vm611_vm2 = vcmask 1044480  }
   0xd   : > { %v1911_v2 = vld [vmem:[%s2438_s1 + $0xb8] sm:$0xff]  ;;  %472 = vmatpush.bf16.msra.mxu1 %v1895_v1  ;;  %v1910_v6 = vld [vmem:[%s2438_s1 + $0xb0] sm:$0xff]  ;;  %v1909_v10 = vld [vmem:[%s2438_s1 + $0xa8] sm:$0xff]  ;;  %vm707_vm3 = vsmask.f32 4352  ;;  %vm917_vm4 = vcmask 1045504  }
   0xe   : > { %v1919_v3 = vld [vmem:[%s2438_s1 + $0xf8] sm:$0xff]  ;;  %565 = vmatpush.bf16.msra.mxu2 %v1911_v2  ;;  %v1918_v7 = vld [vmem:[%s2438_s1 + $0xf0] sm:$0xff]  ;;  %v1917_v11 = vld [vmem:[%s2438_s1 + $0xe8] sm:$0xff]  ;;  %s2118_s9 = scalar_lea.vmem %s2437_s0, %s1998_s19  ;;  %vm1013_vm5 = vsmask.f32 5376  ;;  %s1999_s14 = smul.u32 12, %s2446_s25 }
   0xf   : > { %665 = vmatpush.bf16.msra.mxu3 %v1919_v3  ;;  %v1900_v12 = vld [vmem:[%s2438_s1 + $0x60] sm:$0xff]  ;;  %v2133_v16 = vld [vmem:[%s2118_s9 + $0x8] sm:$0xff]   ;;  %v1899_v18 = vld [vmem:[%s2438_s1 + $0x58] sm:$0xff]  ;;  %s1437_s18 = sshll.u32 %s2446_s25, 1  ;;  %vm1341_vm6 = vcmask 1040384  }
  0x10   : > { %404 = vmatpush.bf16.msra.mxu0 %v1902_v4  ;;  %v1892_v13 = vld [vmem:[%s2438_s1 + $0x20] sm:$0xff]  ;;  %v309_v17 = vld [vmem:[%s2118_s9 + $0xc] sm:$0x1]  ;;  %v1891_v19 = vld [vmem:[%s2438_s1 + $0x18] sm:$0xff]  ;;  %v2143_v20 = vunpack.c.l.b16 %v2133_v16  ;;  %s285_s17 = scalar_lea.vmem %s2443_s6, %s1999_s14  ;;  %s289_s21 = scalar_lea.vmem %s2444_s7, %s1437_s18 }
  0x11   : > { %473 = vmatpush.bf16.msra.mxu1 %v1894_v5  ;;  %v1908_v14 = vld [vmem:[%s2438_s1 + $0xa0] sm:$0xff]  ;;  %v334_v21 = vunpack.c.l.b16 %v309_v17  ;;  %v1907_v22 = vld [vmem:[%s2438_s1 + $0x98] sm:$0xff]  ;;  %v587_v27 = vld [vmem:[%s2118_s9 + $0xc] sm:$0x7] }
  0x12   : > { %566 = vmatpush.bf16.msra.mxu2 %v1910_v6  ;;  %v1916_v15 = vld [vmem:[%s2438_s1 + $0xe0] sm:$0xff]  ;;  %v1915_v23 = vld [vmem:[%s2438_s1 + $0xd8] sm:$0xff]  ;;  %v1898_v28 = vld [vmem:[%s2438_s1 + $0x50] sm:$0xff]  ;;  %v608_v37 = vunpack.c.l.b16 %v587_v27  ;;  %v421_v27 = vpack.c.b16 %v2143_v20, %v2143_v20 }
  0x13   : > { %666 = vmatpush.bf16.msra.mxu3 %v1918_v7  ;;  %v2152_v24 = vld [vmem:[%s2118_s9] sm:$0xff]   ;;  %v1890_v29 = vld [vmem:[%s2438_s1 + $0x10] sm:$0xff]  ;;  %v2164_v30 = vpack.c.b16 %v334_v21, %v2143_v20  ;;  %v1897_v38 = vld [vmem:[%s2438_s1 + $0x48] sm:$0xff] }
  0x14   : > { %405 = vmatpush.bf16.msra.mxu0 %v1901_v8  ;;  %v490_v25 = vld [vmem:[%s2118_s9] sm:$0xe]  ;;  %v341_v31 = vshll.u32 %v2152_v24, 16  ;;  %v1906_v32 = vld [vmem:[%s2438_s1 + $0x90] sm:$0xff]  ;;  %v2174_v34 = vunpack.c.h.b16 %v2152_v24  ;;  %v1889_v39 = vld [vmem:[%s2438_s1 + $0x8] sm:$0xff]  ;;  %v339_v40 = vshrl.u32 %v2152_v24, 16  ;;  %v2195_v47 = vpack.c.b16 %v608_v37, %v2143_v20 }
  0x15   : > { %474 = vmatpush.bf16.msra.mxu1 %v1893_v9  ;;  %v586_v26 = vld [vmem:[%s2118_s9] sm:$0x8]  ;;  %v1914_v33 = vld [vmem:[%s2438_s1 + $0xd0] sm:$0xff]  ;;  %v509_v35 = vunpack.c.l.b16 %v490_v25  ;;  %v346_v42 = vshll.u32 %v2164_v30, 16  ;;  %v1905_v43 = vld [vmem:[%s2438_s1 + $0x88] sm:$0xff]  ;;  %v513_v55 = vrot.slane %v2164_v30, 1 }
  0x16   : > { %567 = vmatpush.bf16.msra.mxu2 %v1909_v10  ;;  %v607_v36 = vunpack.c.l.b16 %v586_v26  ;;  %v343_v41 = vrot.slane %v341_v31, 1  ;;  %v1913_v44 = vld [vmem:[%s2438_s1 + $0xc8] sm:$0xff]  ;;  %v1896_v48 = vld [vmem:[%s2438_s1 + $0x40] sm:$0xff]  ;;  %v613_v57 = vrot.slane %v2195_v47, 3  ;;  %v1927_v58 = vld [vmem:[%s2438_s1 + $0x138] sm:$0xff] }
  0x17   : > { %667 = vmatpush.bf16.msra.mxu3 %v1917_v11  ;;  %v510_v45 = vpack.c.b16 %v2174_v34, %v509_v35  ;;  %v1888_v49 = vld [vmem:[%s2438_s1] sm:$0xff]  ;;  %v2203_v51 = vrot.slane %v346_v42, 1  ;;  %v1943_v59 = vld [vmem:[%s2438_s1 + $0x1b8] sm:$0xff]  ;;  %v1926_v1 = vld [vmem:[%s2438_s1 + $0x130] sm:$0xff]  ;;  %v350_v11 = vshrl.u32 %v2164_v30, 16 }
  0x18   : > { %406 = vmatpush.bf16.msra.mxu0 %v1900_v12  ;;  %v2192_v46 = vpack.c.b16 %v2174_v34, %v607_v36  ;;  %v344_v50 = vor.u32 %v343_v41, %v339_v40  ;;  %v1904_v52 = vld [vmem:[%s2438_s1 + $0x80] sm:$0xff]  ;;  %v1935_v63 = vld [vmem:[%s2438_s1 + $0x178] sm:$0xff]  ;;  %v1942_v2 = vld [vmem:[%s2438_s1 + $0x1b0] sm:$0xff]  ;;  %v720_v40 = vshll.u32 %v2133_v16, 16 }
  0x19   : > { %475 = vmatpush.bf16.msra.mxu1 %v1892_v13  ;;  %v1912_v53 = vld [vmem:[%s2438_s1 + $0xc0] sm:$0xff]  ;;  %v512_v54 = vrot.slane %v510_v45, 1  ;;  %v1951_v0 = vld [vmem:[%s2438_s1 + $0x1f8] sm:$0xff]  ;;  %v1934_v3 = vld [vmem:[%s2438_s1 + $0x170] sm:$0xff]  ;;  %v352_v26 = vor.u32 %v350_v11, %v2203_v51 }
  0x1a   : > { %568 = vmatpush.bf16.msra.mxu2 %v1908_v14  ;;  %v612_v56 = vrot.slane %v2192_v46, 3  ;;  %v349_v60 = vsel %vm337_vm0, %v344_v50, %v2203_v51  ;;  %v1950_v4 = vld [vmem:[%s2438_s1 + $0x1f0] sm:$0xff]  ;;  %v1925_v5 = vld [vmem:[%s2438_s1 + $0x128] sm:$0xff]  ;;  %v1924_v9 = vld [vmem:[%s2438_s1 + $0x120] sm:$0xff]  ;;  %v709_v37 = vshrl.u32 %v2192_v46, 16 }
  0x1b   : > { %668 = vmatpush.bf16.msra.mxu3 %v1916_v15  ;;  %v514_v61 = vsel %vm511_vm1, %v512_v54, %v513_v55  ;;  %v1941_v6 = vld [vmem:[%s2438_s1 + $0x1a8] sm:$0xff]  ;;  %v1940_v10 = vld [vmem:[%s2438_s1 + $0x1a0] sm:$0xff]  ;;  %v992_v14 = vld [vmem:[%s2118_s9 + $0x10] sm:$0x7]  ;;  %v705_v15 = vunpack.c.h.b16 %v2133_v16 }
  0x1c   : > { %407 = vmatpush.bf16.msra.mxu0 %v1899_v18  ;;  %v614_v62 = vsel %vm611_vm2, %v612_v56, %v613_v57  ;;  %v1933_v7 = vld [vmem:[%s2438_s1 + $0x168] sm:$0xff]  ;;  %v886_v12 = vld [vmem:[%s2118_s9 + $0x4] sm:$0xc]  ;;  %v1939_v21 = vld [vmem:[%s2438_s1 + $0x198] sm:$0xff]  ;;  %v1011_v25 = vunpack.c.l.b16 %v992_v14 }
  0x1d   : > { %476 = vmatpush.bf16.msra.mxu1 %v1891_v19  ;;  %v1949_v8 = vld [vmem:[%s2438_s1 + $0x1e8] sm:$0xff]  ;;  %v1932_v17 = vld [vmem:[%s2438_s1 + $0x160] sm:$0xff]  ;;  %v1923_v19 = vld [vmem:[%s2438_s1 + $0x118] sm:$0xff] }
  0x1e   : > { %569 = vmatpush.bf16.msra.mxu2 %v1907_v22  ;;  %v2267_v13 = vld [vmem:[%s2118_s9 + $0x8] sm:$0xff]   ;;  %v1948_v18 = vld [vmem:[%s2438_s1 + $0x1e0] sm:$0xff]  ;;  %v1922_v31 = vld [vmem:[%s2438_s1 + $0x110] sm:$0xff] }
  0x1f   : > { %669 = vmatpush.bf16.msra.mxu3 %v1915_v23  ;;  %v1974_v22 = vunpack.c.l.b16 %v2267_v13  ;;  %v1975_v23 = vunpack.c.h.b16 %v2267_v13  ;;  %v1930_v41 = vld [vmem:[%s2438_s1 + $0x150] sm:$0xff]  ;;  %v1945_v54 = vld [vmem:[%s2438_s1 + $0x1c8] sm:$0xff]  ;;  %v1920_v56 = vld [vmem:[%s2438_s1 + $0x100] sm:$0xff] }
  0x20   : > { %408 = vmatpush.bf16.msra.mxu0 %v1898_v28  ;;  %v1931_v28 = vld [vmem:[%s2438_s1 + $0x158] sm:$0xff]  ;;  %v1946_v30 = vld [vmem:[%s2438_s1 + $0x1d0] sm:$0xff] }
  0x21   : > { %477 = vmatpush.bf16.msra.mxu1 %v1890_v29  ;;  %v1947_v29 = vld [vmem:[%s2438_s1 + $0x1d8] sm:$0xff]  ;;  %v2305_v36 = vpack.c.b16 %v1011_v25, %v1975_v23  ;;  %v1954_v14 = vld [vmem:[%s2438_s1 + $0x210] sm:$0xff] }
  0x22   : > { %570 = vmatpush.bf16.msra.mxu2 %v1906_v32  ;;  %v1938_v32 = vld [vmem:[%s2438_s1 + $0x190] sm:$0xff] }
  0x23   : > { %670 = vmatpush.bf16.msra.mxu3 %v1914_v33  ;;  %v889_v33 = vld [vmem:[%s2118_s9 + $0x10] sm:$0x3]  ;;  %v1023_v47 = vshrl.u32 %v2305_v36, 16 }
  0x24   : > { %409 = vmatpush.bf16.msra.mxu0 %v1897_v38  ;;  %v712_v38 = vshll.u32 %v2192_v46, 16  ;;  %v914_v42 = vunpack.c.l.b16 %v889_v33 }
  0x25   : > { %478 = vmatpush.bf16.msra.mxu1 %v1889_v39  ;;  %v717_v39 = vshrl.u32 %v2133_v16, 16  ;;  %v1952_v16 = vld [vmem:[%s2438_s1 + $0x200] sm:$0xff] }
  0x26   : > { %571 = vmatpush.bf16.msra.mxu2 %v1905_v43  ;;  %v1921_v43 = vld [vmem:[%s2438_s1 + $0x108] sm:$0xff]  ;;  %v714_v50 = vrot.slane %v712_v38, 4 }
  0x27   : > { %671 = vmatpush.bf16.msra.mxu3 %v1913_v44  ;;  %v1937_v44 = vld [vmem:[%s2438_s1 + $0x188] sm:$0xff]  ;;  %v719_v51 = vrot.slane %v717_v39, 3 }
  0x28   : > { %410 = vmatpush.bf16.msra.mxu0 %v1896_v48  ;;  %v1026_v48 = vshll.u32 %v2305_v36, 16 }
  0x29   : > { %479 = vmatpush.bf16.msra.mxu1 %v1888_v49  ;;  %v711_v49 = vrot.slane %v709_v37, 3 }
  0x2a   : > { %572 = vmatpush.bf16.msra.mxu2 %v1904_v52  ;;  %v722_v52 = vrot.slane %v720_v40, 4 }
  0x2b   : > { %672 = vmatpush.bf16.msra.mxu3 %v1912_v53  ;;  %411 = vmatmul.bf16.vlgmr.msra.gmra.mxu0 %v349_v60  ;;  %v1929_v53 = vld [vmem:[%s2438_s1 + $0x148] sm:$0xff]  ;;  %v1025_v60 = vrot.slane %v1023_v47, 2  ;;  %v1963_v47 = vld [vmem:[%s2440_s3 + $0x18] sm:$0xff] }
  0x2c   : > { %775 = vmatpush.bf16.msrb.mxu0 %v1927_v58  ;;  %480 = vmatmul.bf16.vlgmr.msra.gmra.mxu1 %v2152_v24  ;;  %v911_v24 = vunpack.c.l.b16 %v886_v12  ;;  %v1957_v12 = vld [vmem:[%s2438_s1 + $0x228] sm:$0xff] }
  0x2d   : > { %573 = vmatmul.bf16.vlgmr.msra.gmra.mxu2 %v514_v61  ;;  %865 = vmatpush.bf16.msrb.mxu1 %v1935_v63  ;;  %v1028_v61 = vrot.slane %v1026_v48, 3  ;;  %v715_v63 = vor.u32 %v714_v50, %v711_v49 }
  0x2e   : > { %971 = vmatpush.bf16.msrb.mxu2 %v1943_v59  ;;  %673 = vmatmul.bf16.vlgmr.msra.gmra.mxu3 %v614_v62  ;;  %v2303_v35 = vpack.c.b16 %v1974_v22, %v911_v24  ;;  %v1959_v62 = vld [vmem:[%s2438_s1 + $0x238] sm:$0xff]  ;;  %v1124_v24 = vrot.slane %v2305_v36, 3 }
  0x2f   : > { %1081 = vmatpush.bf16.msrb.mxu3 %v1951_v0  ;;  %v723_v0 = vor.u32 %v722_v52, %v719_v51  ;;  %v1967_v36 = vld [vmem:[%s2440_s3 + $0x38] sm:$0xff]  ;;  %v1962_v51 = vld [vmem:[%s2440_s3 + $0x10] sm:$0xff] }
  0x30   : > { %776 = vmatpush.bf16.msrb.mxu0 %v1926_v1  ;;  %v1015_v45 = vshrl.u32 %v2303_v35, 16  ;;  %v1018_v46 = vshll.u32 %v2303_v35, 16  ;;  %v1928_v1 = vld [vmem:[%s2438_s1 + $0x140] sm:$0xff] }
  0x31   : > { %866 = vmatpush.bf16.msrb.mxu1 %v1934_v3  ;;  %v918_v3 = vrot.slane %v2303_v35, 2 }
  0x32   : > { %972 = vmatpush.bf16.msrb.mxu2 %v1942_v2  ;;  %v1017_v58 = vrot.slane %v1015_v45, 2  ;;  %v1020_v59 = vrot.slane %v1018_v46, 3  ;;  %v1944_v2 = vld [vmem:[%s2438_s1 + $0x1c0] sm:$0xff] }
  0x33   : > { %1082 = vmatpush.bf16.msrb.mxu3 %v1950_v4  ;;  %v1964_v45 = vld [vmem:[%s2440_s3 + $0x20] sm:$0xff] }
  0x34   : > { %777 = vmatpush.bf16.msrb.mxu0 %v1925_v5  ;;  %v1021_v5 = vor.u32 %v1020_v59, %v1017_v58  ;;  %v1960_v58 = vld [vmem:[%s2440_s3] sm:$0xff] }
  0x35   : > { %867 = vmatpush.bf16.msrb.mxu1 %v1933_v7  ;;  %v1958_v7 = vld [vmem:[%s2438_s1 + $0x230] sm:$0xff] }
  0x36   : > { %973 = vmatpush.bf16.msrb.mxu2 %v1941_v6  ;;  %v1029_v6 = vor.u32 %v1028_v61, %v1025_v60 }
  0x37   : > { %1083 = vmatpush.bf16.msrb.mxu3 %v1949_v8  ;;  %v724_v8 = vsel %vm707_vm3, %v715_v63, %v723_v0 }
  0x38   : > { %778 = vmatpush.bf16.msrb.mxu0 %v1924_v9  ;;  %v813_v9 = vpack.c.b16 %v2143_v20, %v2174_v34  ;;  %v1030_v11 = vsel %vm1013_vm5, %v1021_v5, %v1029_v6  ;;  %v1956_v20 = vld [vmem:[%s2438_s1 + $0x220] sm:$0xff]  ;;  %v1955_v34 = vld [vmem:[%s2438_s1 + $0x218] sm:$0xff] }
  0x39   : > { %868 = vmatpush.bf16.msrb.mxu1 %v1932_v17  ;;  %v814_v17 = vpack.c.b16 %v705_v15, %v705_v15 }
  0x3a   : > { %974 = vmatpush.bf16.msrb.mxu2 %v1940_v10 }
  0x3b   : > { %1084 = vmatpush.bf16.msrb.mxu3 %v1948_v18  ;;  %416 = vmatmul.bf16.gmra.mxu0 %v352_v26  ;;  %v1102_v18 = vld [vmem:[%s2118_s9 + $0x4] sm:$0x8] }
  0x3c   : > { %779 = vmatpush.bf16.msrb.mxu0 %v1923_v19  ;;  %485 = vmatmul.bf16.gmra.mxu1 %v421_v27  ;;  %v1953_v19 = vld [vmem:[%s2438_s1 + $0x208] sm:$0xff] }
  0x3d   : > { %578 = vmatmul.bf16.gmra.mxu2 %v513_v55  ;;  %869 = vmatpush.bf16.msrb.mxu1 %v1931_v28  ;;  %v916_v55 = vpack.c.b16 %v914_v42, %v1975_v23 }
  0x3e   : > { %975 = vmatpush.bf16.msrb.mxu2 %v1939_v21  ;;  %678 = vmatmul.bf16.gmra.mxu3 %v613_v57  ;;  %v1936_v57 = vld [vmem:[%s2438_s1 + $0x180] sm:$0xff]  ;;  %v1121_v21 = vunpack.c.l.b16 %v1102_v18 }
  0x3f   : > { %1085 = vmatpush.bf16.msrb.mxu3 %v1947_v29  ;;  %v919_v4 = vrot.slane %v916_v55, 2 }
  0x40   : > { %780 = vmatpush.bf16.msrb.mxu0 %v1922_v31  ;;  %v1122_v15 = vpack.c.b16 %v1974_v22, %v1121_v21 }
  0x41   : > { %870 = vmatpush.bf16.msrb.mxu1 %v1930_v41  ;;  %v920_v10 = vsel %vm917_vm4, %v918_v3, %v919_v4  ;;  %v1966_v41 = vld [vmem:[%s2440_s3 + $0x30] sm:$0xff] }
  0x42   : > { %976 = vmatpush.bf16.msrb.mxu2 %v1938_v32  ;;  %v1123_v23 = vrot.slane %v1122_v15, 3 }
  0x43   : > { %1086 = vmatpush.bf16.msrb.mxu3 %v1946_v30  ;;  %v1965_v30 = vld [vmem:[%s2440_s3 + $0x28] sm:$0xff] }
  0x44   : > { %781 = vmatpush.bf16.msrb.mxu0 %v1921_v43  ;;  %v1125_v25 = vsel %vm611_vm2, %v1123_v23, %v1124_v24 }
  0x45   : > { %871 = vmatpush.bf16.msrb.mxu1 %v1929_v53  ;;  %v1961_v53 = vld [vmem:[%s2440_s3 + $0x8] sm:$0xff] }
  0x46   : > { %977 = vmatpush.bf16.msrb.mxu2 %v1937_v44 }
  0x47   : > { %1087 = vmatpush.bf16.msrb.mxu3 %v1945_v54 }
  0x48   : > { %782 = vmatpush.bf16.msrb.mxu0 %v1920_v56 }
  0x49   : > { %872 = vmatpush.bf16.msrb.mxu1 %v1928_v1  ;;  %v1301_v1 = vld [vmem:[%s2442_s5] sm:$0xff] }
  0x4a   : > { %978 = vmatpush.bf16.msrb.mxu2 %v1936_v57 }
  0x4b   : > { %1088 = vmatpush.bf16.msrb.mxu3 %v1944_v2  ;;  %783 = vmatmul.bf16.vlgmr.msrb.gmra.mxu0 %v724_v8  ;;  %v1303_v2 = vld [vmem:[%s2442_s5 + $0x10] sm:$0xff] }
  0x4c   : > { %1176 = vmatpush.bf16.msra.mxu0 %v1959_v62  ;;  %873 = vmatmul.bf16.vlgmr.msrb.gmra.mxu1 %v813_v9 }
  0x4d   : > { %979 = vmatmul.bf16.vlgmr.msrb.gmra.mxu2 %v920_v10  ;;  %1277 = vmatpush.bf16.msra.mxu1 %v1967_v36 }
  0x4e   : > { %1982 = vmatpush.bf16.msra.mxu2 %v1959_v62  ;;  %1089 = vmatmul.bf16.vlgmr.msrb.gmra.mxu3 %v1030_v11 }
  0x4f   : > { %1990 = vmatpush.bf16.msra.mxu3 %v1967_v36 }
  0x50   : > { %1177 = vmatpush.bf16.msra.mxu0 %v1958_v7 }
  0x51   : > { %1278 = vmatpush.bf16.msra.mxu1 %v1966_v41 }
  0x52   : > { %1983 = vmatpush.bf16.msra.mxu2 %v1958_v7 }
  0x53   : > { %1991 = vmatpush.bf16.msra.mxu3 %v1966_v41 }
  0x54   : > { %1178 = vmatpush.bf16.msra.mxu0 %v1957_v12 }
  0x55   : > { %1279 = vmatpush.bf16.msra.mxu1 %v1965_v30 }
  0x56   : > { %1984 = vmatpush.bf16.msra.mxu2 %v1957_v12 }
  0x57   : > { %1992 = vmatpush.bf16.msra.mxu3 %v1965_v30 }
  0x58   : > { %1179 = vmatpush.bf16.msra.mxu0 %v1956_v20 }
  0x59   : > { %1280 = vmatpush.bf16.msra.mxu1 %v1964_v45 }
  0x5a   : > { %1985 = vmatpush.bf16.msra.mxu2 %v1956_v20 }
  0x5b   : > { %788 = vmatmul.bf16.gmra.mxu0 %v723_v0  ;;  %1993 = vmatpush.bf16.msra.mxu3 %v1964_v45 }
  0x5c   : > { %1180 = vmatpush.bf16.msra.mxu0 %v1955_v34  ;;  %878 = vmatmul.bf16.gmra.mxu1 %v814_v17  ;;  %v1302_v17 = vld [vmem:[%s2442_s5 + $0x8] sm:$0xff] }
  0x5d   : > { %984 = vmatmul.bf16.gmra.mxu2 %v919_v4  ;;  %1281 = vmatpush.bf16.msra.mxu1 %v1963_v47 }
  0x5e   : > { %1986 = vmatpush.bf16.msra.mxu2 %v1955_v34  ;;  %1094 = vmatmul.bf16.gmra.mxu3 %v1029_v6  ;;  %v2027_v6 = vmov 0  }
  0x5f   : > { %1994 = vmatpush.bf16.msra.mxu3 %v1963_v47  ;;  %2009 = vset.pattern.permute.xlu0 %v2027_v6 }
  0x60   : > { %1181 = vmatpush.bf16.msra.mxu0 %v1954_v14  ;;  %2010 = vset.pattern.permute.xlu1 %v2027_v6 }
  0x61   : > { %1282 = vmatpush.bf16.msra.mxu1 %v1962_v51  ;;  %1306 = vperm.xlu0 %2009, %v1301_v1  }
  0x62   : > { %1987 = vmatpush.bf16.msra.mxu2 %v1954_v14  ;;  %1316 = vperm.xlu1 %2010, %v1303_v2  }
  0x63   : > { %1995 = vmatpush.bf16.msra.mxu3 %v1962_v51 }
  0x64   : > { %1182 = vmatpush.bf16.msra.mxu0 %v1953_v19 }
  0x65   : > { %1283 = vmatpush.bf16.msra.mxu1 %v1961_v53 }
  0x66   : > { %1988 = vmatpush.bf16.msra.mxu2 %v1953_v19 }
  0x67   : > { %1996 = vmatpush.bf16.msra.mxu3 %v1961_v53 }
  0x68   : > { %1183 = vmatpush.bf16.msra.mxu0 %v1952_v16 }
  0x69   : > { %1284 = vmatpush.bf16.msra.mxu1 %v1960_v58  ;;  %1311 = vperm.xlu0 %2009, %v1302_v17  }
  0x6a   : > { %1989 = vmatpush.bf16.msra.mxu2 %v1952_v16 }
  0x6b   : > { %1184 = vmatmul.bf16.vlgmr.msra.gmra.mxu0 %v1125_v25  ;;  %1997 = vmatpush.bf16.msra.mxu3 %v1960_v58 }
  0x6d   : > { %1189 = vmatmul.bf16.vlgmr.msra.gmra.mxu2 %v1124_v24 }
  0xa8   : > { %v412_v26 = vpop.f32.mrf.mxu0 }
  0xa9   : > { %v481_v27 = vpop.f32.mrf.mxu1 }
  0xaa   : > { %v482_v54 = vadd.f32 %v481_v27, %v412_v26  ;;  %v2011_v27 = vld [vmem:[%s2439_s2] ss:$0 sm:$0xff] }
  0xb0   : > { %v574_v28 = vpop.f32.mrf.mxu2  ;;  %v414_v31 = vpop.f32.mrf.mxu0 }
  0xb1   : > { %v674_v29 = vpop.f32.mrf.mxu3  ;;  %v483_v32 = vpop.f32.mrf.mxu1  ;;  %v583_v59 = vadd.f32 %v574_v28, %v482_v54 }
  0xb2   : > { %v484_v62 = vadd.f32 %v483_v32, %v414_v31 }
  0xb3   : > { %v683_v63 = vadd.f32 %v674_v29, %v583_v59 }
  0xb8   : > { %v576_v33 = vpop.f32.mrf.mxu2  ;;  %v417_v13 = vpop.f32.mrf.mxu0 }
  0xb9   : > { %v2384_v35 = vpop.f32.mrf.mxu3  ;;  %v486_v22 = vpop.f32.mrf.mxu1  ;;  %v584_v3 = vadd.f32 %v576_v33, %v484_v62 }
  0xba   : > { %v487_v61 = vadd.f32 %v486_v22, %v417_v13 }
  0xbb   : > { %v684_v11 = vadd.f32 %v2384_v35, %v584_v3 }
  0xc0   : > { %v579_v37 = vpop.f32.mrf.mxu2  ;;  %v419_v39 = vpop.f32.mrf.mxu0 }
  0xc1   : > { %v679_v38 = vpop.f32.mrf.mxu3  ;;  %v488_v40 = vpop.f32.mrf.mxu1  ;;  %v585_v0 = vadd.f32 %v579_v37, %v487_v61 }
  0xc3   : > { %v685_v10 = vadd.f32 %v679_v38, %v585_v0 }
  0xc8   : > { %v581_v42 = vpop.f32.mrf.mxu2  ;;  %v784_v44 = vpop.f32.mrf.mxu0 }
  0xc9   : > { %v681_v43 = vpop.f32.mrf.mxu3  ;;  %v874_v46 = vpop.f32.mrf.mxu1  ;;  %v793_v4 = vadd.f32 %v784_v44, %v683_v63  ;;  %v2012_v44 = vld [vmem:[%s2441_s4] ss:$0 sm:$0xff] }
  0xcb   : > { %v883_v12 = vadd.f32 %v874_v46, %v793_v4 }
  0xd0   : > { %v980_v48 = vpop.f32.mrf.mxu2  ;;  %v786_v49 = vpop.f32.mrf.mxu0 }
  0xd1   : > { %v1090_v50 = vpop.f32.mrf.mxu3  ;;  %v876_v52 = vpop.f32.mrf.mxu1  ;;  %v989_v34 = vadd.f32 %v980_v48, %v883_v12  ;;  %v794_v14 = vadd.f32 %v786_v49, %v684_v11 }
  0xd3   : > { %v1099_v15 = vadd.f32 %v1090_v50, %v989_v34  ;;  %v884_v23 = vadd.f32 %v876_v52, %v794_v14  ;;  %v1307_v42 = vpop.permute.xlu0 %1306 }
  0xd4   : > { %v1317_v49 = vpop.permute.xlu1 %1316 }
  0xd8   : > { %v982_v55 = vpop.f32.mrf.mxu2  ;;  %v789_v56 = vpop.f32.mrf.mxu0 }
  0xd9   : > { %v1092_v57 = vpop.f32.mrf.mxu3  ;;  %v879_v60 = vpop.f32.mrf.mxu1  ;;  %v795_v20 = vadd.f32 %v789_v56, %v685_v10  ;;  %v990_v25 = vadd.f32 %v982_v55, %v884_v23 }
  0xdb   : > { %v885_v19 = vadd.f32 %v879_v60, %v795_v20  ;;  %v1100_v29 = vadd.f32 %v1092_v57, %v990_v25  ;;  %v1312_v53 = vpop.permute.xlu0 %1311 }
  0xe0   : > { %v985_v5 = vpop.f32.mrf.mxu2  ;;  %v791_v7 = vpop.f32.mrf.mxu0 }
  0xe1   : > { %v1095_v8 = vpop.f32.mrf.mxu3  ;;  %v881_v9 = vpop.f32.mrf.mxu1  ;;  %v991_v24 = vadd.f32 %v985_v5, %v885_v19 }
  0xe3   : > { %v1101_v28 = vadd.f32 %v1095_v8, %v991_v24 }
  0xe8   : > { %v987_v18 = vpop.f32.mrf.mxu2  ;;  %v1185_v21 = vpop.f32.mrf.mxu0 }
  0xe9   : > { %v1097_v16 = vpop.f32.mrf.mxu3  ;;  %v1194_v26 = vadd.f32 %v1185_v21, %v1099_v15 }
  0xeb   : > { %v1201_v31 = vadd.f32 %v2011_v27, %v1194_v26 }
  0xed   : > { %2013 = vtanh.f32 %v1201_v31 }
  0xf0   : > { %v1190_v32 = vpop.f32.mrf.mxu2  ;;  %v1187_v35 = vpop.f32.mrf.mxu0 }
  0xf1   : > { %v1196_v33 = vadd.f32 %v1190_v32, %v1101_v28  ;;  %v1195_v13 = vadd.f32 %v1187_v35, %v1100_v29 }
  0xf3   : > { %v1203_v22 = vadd.f32 %v2011_v27, %v1196_v33  ;;  %v1202_v36 = vadd.f32 %v2011_v27, %v1195_v13  ;;  %v2014_v38 = vpop.eup %2013 }
  0xf5   : > { %2015 = vtanh.f32 %v1203_v22 }
  0xf6   : > { %2017 = vtanh.f32 %v1202_v36 }
  0xf8   : > { %v1192_v37 = vpop.f32.mrf.mxu2 }
  0xfb   : > { %v2016_v39 = vpop.eup %2015 }
  0xfc   : > { %v2018_v40 = vpop.eup %2017  ;;  %v1208_v41 = vpack.c.bf16 %v2016_v39, %v2016_v39 }
  0xfd   : > { %v1207_v30 = vpack.c.bf16 %v2018_v40, %v2014_v38 }
  0xfe   : > { %1290 = vmatmul.bf16.vlgmr.msra.gmra.mxu3 %v1208_v41 }
  0xff   : > { %1285 = vmatmul.bf16.vlgmr.msra.gmra.mxu1 %v1207_v30 }
 0x17c   : > { %v1286_v43 = vpop.f32.mrf.mxu1 }
 0x17d   : > { %v1287_v45 = vadd.f32 %v2012_v44, %v1286_v43 }
 0x17f   : > { %v1319_v51 = vmul.f32 %v1307_v42, %v1287_v45 }
 0x181   : > { %v1291_v46 = vpop.f32.mrf.mxu3  ;;  %v1330_v57 = vmul.f32 %v1319_v51, %v1319_v51 }
 0x182   : > { %v1292_v47 = vadd.f32 %v2012_v44, %v1291_v46 }
 0x184   : > { %v1297_v48 = vpack.c.bf16 %v1292_v47, %v1292_v47  ;;  %v1288_v50 = vpop.f32.mrf.mxu1  ;;  %v1321_v54 = vmul.f32 %v1317_v49, %v1292_v47 }
 0x185   : > { %v1289_v52 = vadd.f32 %v2012_v44, %v1288_v50 }
 0x186   : > { %1300 = vst [vmem:[%s285_s17 + $0x8] sm:$0xf] %v1297_v48  ;;  %v1332_v61 = vmul.f32 %v1321_v54, %v1321_v54 }
 0x187   : > { %v1979_v55 = vpack.c.bf16 %v1289_v52, %v1287_v45  ;;  %v1320_v56 = vmul.f32 %v1312_v53, %v1289_v52 }
 0x189   : > { %1980 = vst [vmem:[%s285_s17] sm:$0xff] %v1979_v55   ;;  %v1322_v58 = vadd.f32 %v1320_v56, %v1319_v51  ;;  %v1331_v59 = vmul.f32 %v1320_v56, %v1320_v56  ;;  %v1293_v60 = vpop.f32.mrf.mxu3 }
 0x18b   : > { %v1323_v62 = vadd.f32 %v1322_v58, %v1321_v54  ;;  %v1333_v63 = vadd.f32 %v1331_v59, %v1330_v57 }
 0x18d   : > { %v1324_v0 = vrot.slane %v1323_v62, 4  ;;  %v1334_v1 = vadd.f32 %v1333_v63, %v1332_v61 }
 0x18f   : > { %v1325_v2 = vadd.f32 %v1324_v0, %v1323_v62  ;;  %v1335_v3 = vrot.slane %v1334_v1, 4 }
 0x191   : > { %v1326_v4 = vrot.slane %v1325_v2, 2  ;;  %v1336_v5 = vadd.f32 %v1335_v3, %v1334_v1 }
 0x193   : > { %v1327_v6 = vadd.f32 %v1326_v4, %v1325_v2  ;;  %v1337_v7 = vrot.slane %v1336_v5, 2 }
 0x195   : > { %v1328_v8 = vrot.slane %v1327_v6, 1  ;;  %v1338_v9 = vadd.f32 %v1337_v7, %v1336_v5 }
 0x197   : > { %v1339_v10 = vrot.slane %v1338_v9, 1  ;;  %v1329_v11 = vadd.f32 %v1328_v8, %v1327_v6 }
 0x199   : > { %v1340_v12 = vadd.f32 %v1339_v10, %v1338_v9 }
 0x19b   : > { %v1342_v20 = vsel %vm1341_vm6, %v1329_v11, %v1340_v12 }
 0x19c   : > { %1343 = vst [vmem:[%s289_s21] sm:$0x3] %v1342_v20 }
 0x19d PF: > { %s18_s24 = sadd.s32 1, %s2025_s24  }
 0x19e   : > { %p15_p4 = scmp.ge.s32.totalorder %s18_s24, 4  }
 0x1a0   :  { %17 = sbr.rel (!%p15_p4) target bundleno = 1 (0x1), region = 94 }

</bundles_post_ra>
